<compile_context>
chip_gen: v7x
topology: tpu7x:2x2x1
jax: 0.10.0
libtpu: 0.0.40
codegen_flags: <defaults>
</compile_context>

<pallas_src>
import functools

import numpy as np
import jax
import jax.numpy as jnp
from jax.experimental import pallas as pl
from jax.experimental.pallas import tpu as pltpu


# ---------------------------------------------------------------------------
# Glue: 1-D pool / bilinear matrices and the fused / separable operators.
# ---------------------------------------------------------------------------
def _avg_pool_matrix(in_size: int, kernel: int, stride: int) -> np.ndarray:
    """1-D average pool as a (P, in_size) matrix (no padding, ceil_mode=False —
    matches F.avg_pool2d defaults)."""
    p = (in_size - kernel) // stride + 1
    m = np.zeros((p, in_size), dtype=np.float64)
    for o in range(p):
        m[o, o * stride: o * stride + kernel] = 1.0 / kernel
    return m


def _bilinear_up_matrix(in_size: int, out_size: int) -> np.ndarray:
    """1-D bilinear upsample with align_corners=True (F.upsample_bilinear)."""
    m = np.zeros((out_size, in_size), dtype=np.float64)
    if in_size == 1:
        m[:, 0] = 1.0
        return m
    if out_size == 1:
        m[0, 0] = 1.0
        return m
    scale = (in_size - 1) / (out_size - 1)
    for o in range(out_size):
        src = o * scale
        i0 = min(int(np.floor(src)), in_size - 1)
        i1 = min(i0 + 1, in_size - 1)
        w = src - i0
        m[o, i0] += (1.0 - w)
        m[o, i1] += w
    return m


def _branch_matrices(h, w, scales, strides, output_size):
    """Per-branch separable matrices M_h (OH, H), M_w (OW, W) as float64."""
    oh, ow = output_size
    out = []
    for k, s in zip(scales, strides):
        kh = k if isinstance(k, int) else k[0]
        kw = k if isinstance(k, int) else k[1]
        sh = s if isinstance(s, int) else s[0]
        sw = s if isinstance(s, int) else s[1]
        a_h = _avg_pool_matrix(h, kh, sh)            # (Ph, H)
        a_w = _avg_pool_matrix(w, kw, sw)            # (Pw, W)
        l_h = _bilinear_up_matrix(a_h.shape[0], oh)  # (OH, Ph)
        l_w = _bilinear_up_matrix(a_w.shape[0], ow)  # (OW, Pw)
        out.append((l_h @ a_h, l_w @ a_w))           # (OH, H), (OW, W)
    return out


@functools.lru_cache(maxsize=None)
def build_fused_operator_t(h, w, scales, strides, output_size) -> np.ndarray:
    """Returns M_full^T of shape (H*W, OH*OW) with
    M_full = I + sum_i kron(M_h_i, M_w_i)."""
    oh, ow = output_size
    m_full = np.zeros((oh * ow, h * w), dtype=np.float64)
    if (oh, ow) == (h, w):
        m_full += np.eye(h * w, dtype=np.float64)    # residual "+ x"
    for m_h, m_w in _branch_matrices(h, w, scales, strides, output_size):
        m_full += np.kron(m_h, m_w)
    return np.ascontiguousarray(m_full.T)            # (H*W, OH*OW)


@functools.lru_cache(maxsize=None)
def build_separable_operators(h, w, scales, strides, output_size):
    """Returns (Mw_cat^T, Mh_stack^T):
       Mw_cat^T  : (W, nb*OW)  — column-mix matrices concatenated along N
       Mh_stack^T: (nb*H, OH)  — row-mix matrices stacked along K (the sum over
                                 branches is folded into this contraction)."""
    branches = _branch_matrices(h, w, scales, strides, output_size)
    mw_cat_t = np.concatenate([m_w.T for (_, m_w) in branches], axis=1)
    mh_stack_t = np.concatenate([m_h.T for (m_h, _) in branches], axis=0)
    return (np.ascontiguousarray(mw_cat_t), np.ascontiguousarray(mh_stack_t))


def _round_up(x: int, m: int) -> int:
    return ((x + m - 1) // m) * m


def _min_sublane(dtype) -> int:
    """Minimum second-minor tile size: 8 for f32, 16 for bf16, 32 for int8/fp8."""
    return max(8, 32 // jnp.dtype(dtype).itemsize)


def _vmem_budget_bytes() -> int:
    """Per-generation scoped-VMEM budget: ~32 MiB on v7x (64 MiB physical),
    up to ~96 MiB on v5e/v6e (128 MiB physical)."""
    cap = 64 * 2**20
    try:
        info = pltpu.get_tpu_info()
        cap = int(getattr(info, "vmem_capacity_bytes", cap))
    except Exception:
        pass
    if cap >= 128 * 2**20:
        return 96 * 2**20
    return min(32 * 2**20, max(cap // 2, 16 * 2**20))


# ---------------------------------------------------------------------------
# Pallas GEMM kernels.
# ---------------------------------------------------------------------------
def _gemm_kernel_single(a_ref, b_ref, o_ref):
    # Single K step: no reduction axis, no accumulator, one dot -> o_ref.
    o_ref[...] = jnp.dot(a_ref[...], b_ref[...],
                         preferred_element_type=jnp.float32).astype(o_ref.dtype)


def _gemm_kernel_multi_f32out(a_ref, b_ref, o_ref):
    # f32 output: accumulate straight into the (VMEM-resident) output block.
    @pl.when(pl.program_id(2) == 0)
    def _():
        o_ref[...] = jnp.zeros_like(o_ref)

    o_ref[...] += jnp.dot(a_ref[...], b_ref[...],
                          preferred_element_type=jnp.float32)


def _gemm_kernel_multi_acc(a_ref, b_ref, o_ref, acc_ref):
    # Non-f32 output: classic f32 scratch accumulator + final cast.
    @pl.when(pl.program_id(2) == 0)
    def _():
        acc_ref[...] = jnp.zeros_like(acc_ref)

    acc_ref[...] += jnp.dot(a_ref[...], b_ref[...],
                            preferred_element_type=jnp.float32)

    @pl.when(pl.program_id(2) == pl.num_programs(2) - 1)
    def _():
        o_ref[...] = acc_ref[...].astype(o_ref.dtype)


def _pallas_gemm(a, b, out_dtype=None):
    """Lane-dense tiled MXU GEMM: returns a @ b, a:(M,K), b:(K,N) -> (M,N)."""
    out_dtype = jnp.dtype(out_dtype if out_dtype is not None else a.dtype)
    m, k = a.shape
    k2, n = b.shape
    assert k == k2

    sub = _min_sublane(a.dtype)
    budget = _vmem_budget_bytes()
    a_isz = jnp.dtype(a.dtype).itemsize
    b_isz = jnp.dtype(b.dtype).itemsize
    o_isz = out_dtype.itemsize

    # ---- tile selection ----------------------------------------------------
    m_eff = max(m, sub)
    tm = min(_round_up(m_eff, sub), 512)
    k128 = _round_up(k, 128)
    n128 = _round_up(n, 128)
    tk = min(k128, 2048)       # prefer covering all of K in one step
    tn = min(n128, 1024)

    def step_bytes(tm_, tk_, tn_):
        extra_acc = tm_ * tn_ * 4 if tk_ < k128 else 0
        return (2 * tm_ * tk_ * a_isz + 2 * tk_ * tn_ * b_isz
                + 2 * tm_ * tn_ * o_isz + extra_acc)

    # Shrink tiles until double-buffered working set fits half the budget.
    while step_bytes(tm, tk, tn) > budget // 2:
        if tk >= max(tn, 256) and tk > 128:
            tk = max(128, _round_up(tk // 2, 128))
        elif tn > 128:
            tn = max(128, _round_up(tn // 2, 128))
        elif tm > sub:
            tm = max(sub, _round_up(tm // 2, sub))
        else:
            break

    m_pad = _round_up(m_eff, tm)
    k_pad = _round_up(k, tk)
    n_pad = _round_up(n, tn)

    # Megacore (v7x has 2 TCs): guarantee >= 2 tiles on a "parallel" axis.
    if (m_pad // tm) * (n_pad // tn) == 1:
        if n_pad >= 256:
            tn = _round_up(n_pad // 2, 128)
            n_pad = _round_up(n, tn)
        elif tm >= 2 * sub:
            tm = _round_up(tm // 2, sub)
            m_pad = _round_up(m_eff, tm)

    nm, nn, nk = m_pad // tm, n_pad // tn, k_pad // tk

    # Zero-pad operands so every block load/store is full-size and unmasked
    # (mathematically inert; padded rows/cols are sliced away below).
    if (m_pad, k_pad) != (m, k):
        a = jnp.pad(a, ((0, m_pad - m), (0, k_pad - k)))
    if (k_pad, n_pad) != (k, n):
        b = jnp.pad(b, ((0, k_pad - k), (0, n_pad - n)))

    vmem_limit = int(min(budget, max(2 * step_bytes(tm, tk, tn), 16 * 2**20)))

    if nk == 1:
        # Fast path: whole K resident, no reduction axis, no accumulator.
        out = pl.pallas_call(
            _gemm_kernel_single,
            out_shape=jax.ShapeDtypeStruct((m_pad, n_pad), out_dtype),
            grid_spec=pltpu.PrefetchScalarGridSpec(
                num_scalar_prefetch=0,
                grid=(nm, nn),
                in_specs=[
                    pl.BlockSpec((tm, tk), lambda i, j: (i, 0)),
                    pl.BlockSpec((tk, tn), lambda i, j: (0, j)),
                ],
                out_specs=pl.BlockSpec((tm, tn), lambda i, j: (i, j)),
            ),
            compiler_params=pltpu.CompilerParams(
                dimension_semantics=("parallel", "parallel"),
                vmem_limit_bytes=vmem_limit),
        )(a, b)
    else:
        if out_dtype == jnp.dtype(jnp.float32):
            kernel = _gemm_kernel_multi_f32out
            scratch = []
        else:
            kernel = _gemm_kernel_multi_acc
            scratch = [pltpu.VMEM((tm, tn), jnp.float32)]
        out = pl.pallas_call(
            kernel,
            out_shape=jax.ShapeDtypeStruct((m_pad, n_pad), out_dtype),
            grid_spec=pltpu.PrefetchScalarGridSpec(
                num_scalar_prefetch=0,
                grid=(nm, nn, nk),
                in_specs=[
                    pl.BlockSpec((tm, tk), lambda i, j, kk: (i, kk)),
                    pl.BlockSpec((tk, tn), lambda i, j, kk: (kk, j)),
                ],
                out_specs=pl.BlockSpec((tm, tn), lambda i, j, kk: (i, j)),
                scratch_shapes=scratch,
            ),
            compiler_params=pltpu.CompilerParams(
                dimension_semantics=("parallel", "parallel", "arbitrary"),
                vmem_limit_bytes=vmem_limit),
        )(a, b)

    if (m_pad, n_pad) != (m, n):
        out = out[:m, :n]
    return out


# ---------------------------------------------------------------------------
# Jitted compute paths (operators passed as array arguments, not constants).
# ---------------------------------------------------------------------------
@jax.jit
def _psp_fused_jit(x, m_full_t):
    b, c, h, w = x.shape
    out_flat = _pallas_gemm(x.reshape(b * c, h * w), m_full_t, out_dtype=x.dtype)
    return out_flat.reshape(b, c, h, w)


@jax.jit
def _psp_separable_jit(x, mw_cat_t, mh_stack_t):
    b, c, h, w = x.shape
    nbh, oh = mh_stack_t.shape
    nb = nbh // h
    ow = mw_cat_t.shape[1] // nb
    # GEMM 1 — column mix, all branches at once:
    #   (B*C*H, W) @ (W, nb*OW) -> (B*C*H, nb*OW)
    p = _pallas_gemm(x.reshape(b * c * h, w), mw_cat_t, out_dtype=jnp.float32)
    # Rearrange so the GEMM-2 contraction runs over (branch, H) jointly,
    # which folds the sum over branches into the matmul.
    p = p.reshape(b * c, h, nb, ow).transpose(0, 3, 2, 1).reshape(b * c * ow, nb * h)
    # GEMM 2 — row mix + branch sum: (B*C*OW, nb*H) @ (nb*H, OH) -> (B*C*OW, OH)
    z = _pallas_gemm(p, mh_stack_t, out_dtype=jnp.float32)
    z = z.reshape(b, c, ow, oh).transpose(0, 1, 3, 2)
    return (x.astype(jnp.float32) + z).astype(x.dtype)


# Dense fused operator is used only while it stays comfortably VMEM/HBM-sized;
# above this, the separable two-GEMM form is both cheaper in FLOPs and memory.
_FUSED_OPERATOR_MAX_BYTES = 8 * 2**20


def _psp_separable(x, scales, strides, output_size):
    h, w = x.shape[2], x.shape[3]
    mw_cat_t, mh_stack_t = build_separable_operators(h, w, scales, strides,
                                                     output_size)
    return _psp_separable_jit(x,
                              jnp.asarray(mw_cat_t, jnp.float32),
                              jnp.asarray(mh_stack_t, jnp.float32))


def psp_pooling(x, scales, strides, output_size):
    """Same semantics as the PyTorch module's forward. x: (B, C, H, W);
    output_size must equal (H, W) so the residual `+ x` is shape-consistent."""
    scales = tuple(scales)
    strides = tuple(strides)
    output_size = tuple(output_size)
    b, c, h, w = x.shape
    oh, ow = output_size
    assert (oh, ow) == (h, w), "output_size must match input spatial size"

    if (h * w) * (oh * ow) * 4 <= _FUSED_OPERATOR_MAX_BYTES:
        # Small spatial extent: one fused GEMM, operator VMEM-resident.
        # TODO(synk): optional bf16 operator (halves HBM bytes, mainly v5e) —
        # left out because interpolation weights are not bf16-exact.
        m_full_t = jnp.asarray(
            build_fused_operator_t(h, w, scales, strides, output_size),
            dtype=x.dtype)
        return _psp_fused_jit(x, m_full_t)
    # Large spatial extent: separable two-GEMM path.
    return _psp_separable(x, scales, strides, output_size)


# ---------------------------------------------------------------------------
# Pure-JAX reference (separable form, full precision) for sanity checks.
# ---------------------------------------------------------------------------
def psp_pooling_ref(x, scales, strides, output_size):
    h, w = x.shape[2], x.shape[3]
    out = x.astype(jnp.float32)
    for m_h, m_w in _branch_matrices(h, w, tuple(scales), tuple(strides),
                                     tuple(output_size)):
        out = out + jnp.einsum(
            "oh,bchw,pw->bcop",
            jnp.asarray(m_h, jnp.float32), x.astype(jnp.float32),
            jnp.asarray(m_w, jnp.float32),
            precision=jax.lax.Precision.HIGHEST)
    return out.astype(x.dtype)


if __name__ == "__main__":
    # Small shapes consistent with the module's forward.
    B, C, H, W = 2, 4, 16, 16
    scales = (16, 8, 4, 2)          # kernel sizes for the 4 pyramid levels
    strides = (16, 8, 4, 2)         # matching strides
    output_size = (H, W)

    key = jax.random.PRNGKey(0)
    x = jax.random.normal(key, (B, C, H, W), dtype=jnp.float32)

    ref = psp_pooling_ref(x, scales, strides, output_size)

    # Fused single-GEMM path (dispatcher default at this spatial size).
    out = jax.block_until_ready(psp_pooling(x, scales, strides, output_size))
    assert out.shape == (B, C, H, W)
    np.testing.assert_allclose(np.asarray(out), np.asarray(ref),
                               rtol=1e-5, atol=2e-5)

    # Separable two-GEMM fallback (used at large H*W) — exercise it too.
    out_sep = jax.block_until_ready(
        _psp_separable(x, scales, strides, output_size))
    assert out_sep.shape == (B, C, H, W)
    np.testing.assert_allclose(np.asarray(out_sep), np.asarray(ref),
                               rtol=1e-5, atol=2e-5)

    print("KERNEL_OK")
</pallas_src>

<mosaic_0001>
module attributes {stable_mosaic.version = 11 : i64} {
  func.func @_gemm_kernel_single(%arg0: i32, %arg1: i32, %arg2: memref<8x256xf32, #tpu.memory_space<vmem>>, %arg3: memref<256x128xf32, #tpu.memory_space<vmem>>, %arg4: memref<8x128xf32, #tpu.memory_space<vmem>>) attributes {dimension_semantics = [#tpu.dimension_semantics<parallel>, #tpu.dimension_semantics<parallel>], iteration_bounds = array<i64: 1, 2>, scalar_prefetch = 0 : i64, scratch_operands = 0 : i64, tpu.core_type = #tpu.core_type<tc>, window_params = [{transform_indices = @transform_0, window_bounds = array<i64: 8, 256>}, {transform_indices = @transform_1, window_bounds = array<i64: 256, 128>}, {transform_indices = @transform_2, window_bounds = array<i64: 8, 128>}]} {
    %c0 = arith.constant 0 : index
    %c0_0 = arith.constant 0 : index
    %0 = vector.load %arg2[%c0, %c0_0] : memref<8x256xf32, #tpu.memory_space<vmem>>, vector<8x256xf32>
    %c0_1 = arith.constant 0 : index
    %c0_2 = arith.constant 0 : index
    %1 = vector.load %arg3[%c0_1, %c0_2] : memref<256x128xf32, #tpu.memory_space<vmem>>, vector<256x128xf32>
    %cst = arith.constant dense<0.000000e+00> : vector<8x128xf32>
    %2 = tpu.matmul %0, %1, %cst {dimension_numbers = #tpu.dot_dimension_numbers<[1], [0], [0], [1], [0, 0, 1, 1], [], []>} : vector<8x256xf32>, vector<256x128xf32>, vector<8x128xf32> -> vector<8x128xf32>
    %c0_3 = arith.constant 0 : index
    %c0_4 = arith.constant 0 : index
    %3 = vector.load %arg4[%c0_3, %c0_4] : memref<8x128xf32, #tpu.memory_space<vmem>>, vector<8x128xf32>
    tpu.vector_store %arg4[%c0_3, %c0_4], %2 {strides = array<i32>} : memref<8x128xf32, #tpu.memory_space<vmem>>, vector<8x128xf32>,
    return
  }
  func.func @transform_0(%arg0: i32, %arg1: i32) -> (i32, i32) {
    %c0_i32 = arith.constant 0 : i32
    %c0_i32_0 = arith.constant 0 : i32
    return %arg0, %c0_i32 : i32, i32
  }
  func.func @transform_1(%arg0: i32, %arg1: i32) -> (i32, i32) {
    %c0_i32 = arith.constant 0 : i32
    %c0_i32_0 = arith.constant 0 : i32
    return %c0_i32, %arg1 : i32, i32
  }
  func.func @transform_2(%arg0: i32, %arg1: i32) -> (i32, i32) {
    %c0_i32 = arith.constant 0 : i32
    return %arg0, %arg1 : i32, i32
  }
}

</mosaic_0001>

<bundles_post_ra>
// kernel: _psp_fused_jit.1
= control target key start
LH: loop header
LB: loop body
LE: loop exit
PB: predicated region body
PF: predicated region fallthrough
CT: control target
= control target key end

     0   :  { %7 = vsyncpa [#allocation3], 0  ;;  %s816_s0 = inlined_call_operand.vmem [shape: f32[8,256], index: 0, kind: input, shape index: {}]   ;;  %s817_s1 = inlined_call_operand.hbm [shape: f32[256,256], index: 1, kind: input, shape index: {}]   ;;  %s818_s2 = inlined_call_operand.vmem [shape: f32[8,256], index: 2, kind: output, shape index: {}]  }
   0x1   :  { %9 = vsyncpa [#allocation3 + $0x1], 0  ;;  %s650_s9 = smov 0   ;;  %s652_s10 = smov 0  }
   0x2   :  { %s654_s11 = smov 0   ;;  %s656_s12 = smov 0  }
   0x3   :  { %s658_s13 = smov 0   ;;  %s660_s14 = smov 0  }
   0x4 LB: > { %s412_s15 = sadd.s32 4294967295, %s629_s14   ;;  %s24_s16 = sadd.s32 1, %s625_s13  ;;  %s629_s14 = sphi %s660_s14, %s15_s14   ;;  %s625_s13 = sphi %s658_s13, %s827_s13   ;;  %s621_s12 = sphi %s656_s12, %s826_s12   ;;  %s617_s11 = sphi %s654_s11, %s825_s11   ;;  %s613_s10 = sphi %s652_s10, %s824_s10   ;;  %s609_s9 = sphi %s650_s9, %s823_s9  }
   0x5   : > { %p25_p0 = scmp.ge.s32.totalorder %s24_s16, 2  ;;  %s60_s17 = sadd.s32 1, %s617_s11 }
   0x6   : > { %p67_p1 = scmp.ne.s32.totalorder %s617_s11, %s613_s10  ;;  %p68_p2 = scmp.eq.s32.totalorder %s629_s14, 0 }
   0x7   : > { %s829_s16 = smov (%p25_p0, %s24_s16), 0  ;;  %p73_p4 = scmp.ne.s32.totalorder %s613_s10, %s609_s9 }
   0x8   : > { %p686_p3 = por %p68_p2, %p67_p1  ;;  %s57_s19 = ssub.s32 %s625_s13, %s829_s16 }
   0x9   : > { %p74_p5 = scmp.eq.s32.totalorder %s412_s15, 0  ;;  %p58_p6 = scmp.eq.s32.totalorder %s57_s19, 0 }
   0xa   : > { %p497_p8 = scmp.lt.s32.totalorder %s629_s14, 2  ;;  %s133_s22 = sand.u32 1, %s617_s11  }
   0xb   : > { %p693_p7 = por %p74_p5, %p73_p4  ;;  %s418_s23 = sshll.u32 %s625_s13, 7 }
   0xc   : > { %s699_s21 = scalar_select %p58_p6, %s617_s11, %s60_s17  }
   0xd   : > { %s417_s24 = sshll.u32 %s133_s22, 8  ;;  %s706_s27 = scalar_lea.hbm %s817_s1, %s418_s23 }
   0xe   : > { %s137_s28 = scalar_lea.vmem [#allocation2], %s417_s24  ;;  %p710_p9 = pnand %p497_p8, %p686_p3 }
   0xf   : > { %s143_s29 = sshll.u32 %s137_s28, 4  ;;  %s717_s3 = scalar_lea.sflag [#allocation3], %s133_s22  ;;  %s714_s29 = int_to_ptr.vmem [resolvable:$true] %s143_s29 }
  0x10   : > { %s549_s4 = scalar_lea.hbm %s706_s27, 4096  ;;  %p551_p12 = pneg %p710_p9 }
  0x11   : > { %p550_p11 = scmp.ne.s32.totalorder %s706_s27, %s549_s4  ;;  %s554_s7 = scalar_lea.hbm %s817_s1, 8192 }
  0x12   : > { %p555_p1 = scmp.lt.u32.totalorder %s706_s27, %s817_s1  ;;  %p556_p2 = scmp.lt.u32.totalorder %s554_s7, %s549_s4 }
  0x13   : > { %p552_p13 = pnand %p551_p12, %p550_p11  ;;  %p558_p4 = scmp.lt.u32.totalorder %s549_s4, %s706_s27 }
  0x14   : > { %p557_p3 = por %p556_p2, %p555_p1 }
  0x15   : > { %p553_p0 = pneg %p552_p13 }
  0x16   : > { %p559_p5 = por %p558_p4, %p557_p3 }
  0x18   : > { %p560_p6 = pnand %p559_p5, %p553_p0 }
  0x1a   : > { %563 = shalt.err (!%p560_p6)
}
  0x1b   : > { %s564_s15 = scalar_lea.vmem %s714_s29, 4096  ;;  %s631_s17 = smov [#allocation2]  }
  0x1c   : > { %p565_p8 = scmp.ne.s32.totalorder %s714_s29, %s564_s15  ;;  %s569_s18 = sshll.u32 %s631_s17, 4  ;;  %s570_s18 = int_to_ptr.vmem [resolvable:$false] %s569_s18 }
  0x1d   : > { %s571_s19 = scalar_lea.vmem %s570_s18, 8192  ;;  %p572_p10 = scmp.lt.s32.totalorder %s714_s29, %s570_s18 }
  0x1e   : > { %p567_p11 = pnand %p565_p8, %p551_p12  ;;  %p573_p1 = scmp.lt.s32.totalorder %s571_s19, %s564_s15 }
  0x20   : > { %p568_p13 = pneg %p567_p11  ;;  %p574_p2 = por %p573_p1, %p572_p10 }
  0x22   : > { %p575_p3 = pnand %p574_p2, %p568_p13 }
  0x24   : > { %578 = shalt.err (!%p575_p3)
}
  0x25   : > { %s632_s22 = smov 256   ;;  %s633_s23 = smov 128  }
  0x26   : > { %s634_s24 = smov 8   ;;  %p151_p12 = scmp.lt.s32.totalorder %s629_s14, 3 }
  0x27   : > { %496 = dma.hbm_to_vmem [thread:$0]  (!%p710_p9), %s706_s27, 4096, %s714_s29, %s717_s3, %s632_s22, %s633_s23, %s634_s24  }
  0x28   : > { %p822_p0 = scmp.ge.s32.totalorder %s629_s14, 1 }
  0x2a   : > { %p152_p4 = pnand %p822_p0, %p151_p12 }
  0x2b   : > { %s157_s25 = sand.u32 (!%p152_p4), 1, %s613_s10  }
  0x2c   : > { %155 = sbr.rel (%p152_p4) target bundleno = 303 (0x12f), region = 28  ;;  %s420_s26 = sshll.u32 (!%p152_p4), %s157_s25, 8 }
  0x2d   : > { %s158_s28 = scalar_lea.sflag (!%p152_p4), [#allocation3], %s157_s25  ;;  %s749_s4 = scalar_lea.vmem (!%p152_p4), [#allocation2], %s420_s26 }
  0x33   : > { %604 = dma.done.wait (%p693_p7), %s158_s28, 4096  }
  0x34   : > { %606 = vsyncadd (%p693_p7), %s158_s28, 4294963200  ;;  %v221_v0 = vld [vmem:[%s749_s4 + $0x80] sm:$0xff]  ;;  %v222_v1 = vld [vmem:[%s749_s4 + $0x88] sm:$0xff]  ;;  %p197_p7 = scmp.lt.s32.totalorder %s621_s12, 1 }
  0x35   : > { %v205_v2 = vld [vmem:[%s749_s4] sm:$0xff]  ;;  %v459_v3 = vpack.c.bf16 %v222_v1, %v221_v0  ;;  %v206_v4 = vld [vmem:[%s749_s4 + $0x8] sm:$0xff]  ;;  %v223_v5 = vld [vmem:[%s749_s4 + $0x90] sm:$0xff] }
  0x36   : > { %v224_v6 = vld [vmem:[%s749_s4 + $0x98] sm:$0xff]  ;;  %v461_v7 = vpack.c.bf16 %v206_v4, %v205_v2  ;;  %v207_v9 = vld [vmem:[%s749_s4 + $0x10] sm:$0xff]  ;;  %v225_v11 = vld [vmem:[%s749_s4 + $0xa0] sm:$0xff]  ;;  %s831_s12 = smov (!%p197_p7, %s621_s12), 1 }
  0x37   : > { %v463_v8 = vpack.c.bf16 %v224_v6, %v223_v5  ;;  %v208_v10 = vld [vmem:[%s749_s4 + $0x18] sm:$0xff]  ;;  %460 = vmatprep.subr.bf16.mxu0 %v459_v3  ;;  %v226_v12 = vld [vmem:[%s749_s4 + $0xa8] sm:$0xff]  ;;  %v209_v15 = vld [vmem:[%s749_s4 + $0x20] sm:$0xff]  ;;  %s421_s3 = sshll.u32 %s831_s12, 3 }
  0x38   : > { %462 = vmatpush3.bf16.msra.mxu0 %v461_v7  ;;  %v465_v13 = vpack.c.bf16 %v208_v10, %v207_v9  ;;  %v467_v14 = vpack.c.bf16 %v226_v12, %v225_v11  ;;  %v210_v16 = vld [vmem:[%s749_s4 + $0x28] sm:$0xff]  ;;  %v227_v17 = vld [vmem:[%s749_s4 + $0xb0] sm:$0xff]  ;;  %v228_v18 = vld [vmem:[%s749_s4 + $0xb8] sm:$0xff]  ;;  %s202_s7 = scalar_lea.vmem %s818_s2, %s421_s3 }
  0x39   : > { %464 = vmatprep.subr.bf16.mxu0 %v463_v8  ;;  %v469_v19 = vpack.c.bf16 %v210_v16, %v209_v15  ;;  %v471_v20 = vpack.c.bf16 %v228_v18, %v227_v17  ;;  %v211_v21 = vld [vmem:[%s749_s4 + $0x30] sm:$0xff]  ;;  %v212_v22 = vld [vmem:[%s749_s4 + $0x38] sm:$0xff]  ;;  %v229_v23 = vld [vmem:[%s749_s4 + $0xc0] sm:$0xff] }
  0x3a   : > { %v230_v24 = vld [vmem:[%s749_s4 + $0xc8] sm:$0xff]  ;;  %v473_v26 = vpack.c.bf16 %v212_v22, %v211_v21  ;;  %v213_v28 = vld [vmem:[%s749_s4 + $0x40] sm:$0xff]  ;;  %v231_v30 = vld [vmem:[%s749_s4 + $0xd0] sm:$0xff] }
  0x3b   : > { %v204_v25 = vld [vmem:[%s816_s0 + $0x8] sm:$0xff]  ;;  %v475_v27 = vpack.c.bf16 %v230_v24, %v229_v23  ;;  %v232_v31 = vld [vmem:[%s749_s4 + $0xd8] sm:$0xff]  ;;  %v215_v34 = vld [vmem:[%s749_s4 + $0x50] sm:$0xff] }
  0x3c   : > { %466 = vmatpush3.bf16.msra.mxu0 %v465_v13  ;;  %301 = vmatprep.mubr.f32.mxu0 %v204_v25  ;;  %v214_v29 = vld [vmem:[%s749_s4 + $0x48] sm:$0xff]  ;;  %v479_v33 = vpack.c.bf16 %v232_v31, %v231_v30  ;;  %v216_v35 = vld [vmem:[%s749_s4 + $0x58] sm:$0xff]  ;;  %v233_v36 = vld [vmem:[%s749_s4 + $0xe0] sm:$0xff] }
  0x3d   : > { %468 = vmatprep.subr.bf16.mxu0 %v467_v14  ;;  %v477_v32 = vpack.c.bf16 %v214_v29, %v213_v28  ;;  %v234_v37 = vld [vmem:[%s749_s4 + $0xe8] sm:$0xff]  ;;  %v481_v38 = vpack.c.bf16 %v216_v35, %v215_v34  ;;  %v217_v40 = vld [vmem:[%s749_s4 + $0x60] sm:$0xff]  ;;  %v235_v42 = vld [vmem:[%s749_s4 + $0xf0] sm:$0xff] }
  0x3e   : > { %v483_v39 = vpack.c.bf16 %v234_v37, %v233_v36  ;;  %v218_v41 = vld [vmem:[%s749_s4 + $0x68] sm:$0xff]  ;;  %v236_v43 = vld [vmem:[%s749_s4 + $0xf8] sm:$0xff]  ;;  %v219_v46 = vld [vmem:[%s749_s4 + $0x70] sm:$0xff] }
  0x3f   : > { %v485_v44 = vpack.c.bf16 %v218_v41, %v217_v40  ;;  %v487_v45 = vpack.c.bf16 %v236_v43, %v235_v42  ;;  %v220_v47 = vld [vmem:[%s749_s4 + $0x78] sm:$0xff]  ;;  %v203_v49 = vld [vmem:[%s816_s0] sm:$0xff] }
  0x40   : > { %470 = vmatpush3.bf16.msra.mxu0 %v469_v19  ;;  %v489_v48 = vpack.c.bf16 %v220_v47, %v219_v46 }
  0x41   : > { %472 = vmatprep.subr.bf16.mxu0 %v471_v20 }
  0x44   : > { %474 = vmatpush3.bf16.msra.mxu0 %v473_v26 }
  0x45   : > { %476 = vmatprep.subr.bf16.mxu0 %v475_v27 }
  0x48   : > { %478 = vmatpush3.bf16.msra.mxu0 %v477_v32 }
  0x49   : > { %480 = vmatprep.subr.bf16.mxu0 %v479_v33 }
  0x4c   : > { %482 = vmatpush3.bf16.msra.mxu0 %v481_v38 }
  0x4d   : > { %484 = vmatprep.subr.bf16.mxu0 %v483_v39 }
  0x50   : > { %486 = vmatpush3.bf16.msra.mxu0 %v485_v44 }
  0x51   : > { %488 = vmatprep.subr.bf16.mxu0 %v487_v45 }
  0x54   : > { %490 = vmatpush3.bf16.msra.mxu0 %v489_v48 }
  0x57   : > { %302 = vmatmul.mubr.f32.vlgmr.msra.gmra.mrb[0].mxu0 %v203_v49 }
 0x12a   : > { %v456_v50 = vpop.f32.mrb[0].mxu0 }
 0x12b   : > { %v457_v51 = vpop.f32.mrb[1].mxu0 }
 0x12c   : > { %v458_v52 = vadd.f32 %v457_v51, %v456_v50 }
 0x12e   : > { %307 = vst [vmem:[%s202_s7] sm:$0xff] %v458_v52 }
 0x12f PF: > { %s15_s14 = sadd.s32 1, %s629_s14   ;;  %s823_s9 = smov %s613_s10 }
 0x130   : > { %p12_p9 = scmp.ge.s32.totalorder %s15_s14, 4   ;;  %s824_s10 = smov %s617_s11 }
 0x131   : > { %s825_s11 = smov %s699_s21  ;;  %s826_s12 = smov %s625_s13 }
 0x132   : > { %s827_s13 = smov %s829_s16  ;;  %14 = sbr.rel (!%p12_p9) target bundleno = 4 (0x4), region = 71 }
 0x139   :  { %335 = vsyncpa [#allocation3], 1 }
 0x13a   :  { %337 = vsyncpa [#allocation3 + $0x1], 1 }

</bundles_post_ra>
